<compile_context>
chip_gen: v7x
topology: tpu7x:2x2x1
jax: 0.10.0
libtpu: 0.0.40
codegen_flags: <defaults>
</compile_context>

<pallas_src>
import functools

import jax
import jax.numpy as jnp
from jax.experimental import pallas as pl
from jax.experimental.pallas import tpu as pltpu

_LANE_COLS = 1024            # lane-dense slab width (multiple of 128)
_MIN_PALLAS_ELEMS = 1 << 18  # below this, plain fused XLA is faster


def _pairwise_loss_kernel(d_ref, l_ref, o_ref, *, margin):
    d = d_ref[...]
    l = l_ref[...]
    # relu(margin - labels * (1 - distances))  -- pure VPU elementwise
    o_ref[...] = jnp.maximum(margin - l * (1.0 - d), 0.0).astype(o_ref.dtype)


def _num_tensorcores():
    """2 on v7x (grid sharded across TCs), else 1 (v5e/v6e)."""
    try:
        kind = jax.devices()[0].device_kind.lower()
    except Exception:
        return 1
    return 2 if ("v7" in kind or "7x" in kind) else 1


def _sublane(dtype):
    # Minimum sublane tile: 8 for 4-byte, 16 for 2-byte, 32 for 1-byte dtypes.
    return 8 * max(1, 4 // jnp.dtype(dtype).itemsize)


def _pick_block_rows(rows, sublane, num_cores, target_rows):
    if num_cores <= 1:
        # Single TensorCore: never split below the target tile.  A block equal
        # to the full array dim is always a legal block shape.
        return min(target_rows, rows)
    # v7x: aim for >= 2 steps per core and a core-divisible step count so both
    # cores stay busy and DMA in/out overlap per core.
    min_steps = 2 * num_cores
    if rows < min_steps * sublane:
        return rows
    steps = max(min_steps, pl.cdiv(rows, target_rows))
    if steps % num_cores:
        steps += num_cores - (steps % num_cores)
    block = pl.cdiv(pl.cdiv(rows, steps), sublane) * sublane
    return max(sublane, min(block, target_rows, rows))


def _pairwise_loss_2d(d2, l2, margin, block_rows, vmem_limit_bytes):
    rows, cols = d2.shape
    itemsize = jnp.dtype(d2.dtype).itemsize
    kernel = functools.partial(_pairwise_loss_kernel, margin=float(margin))
    cost = pl.CostEstimate(
        flops=3 * rows * cols,
        transcendentals=0,
        bytes_accessed=3 * rows * cols * itemsize,
    )
    return pl.pallas_call(
        kernel,
        out_shape=jax.ShapeDtypeStruct((rows, cols), d2.dtype),
        grid=(pl.cdiv(rows, block_rows),),
        in_specs=[
            pl.BlockSpec((block_rows, cols), lambda i: (i, 0)),
            pl.BlockSpec((block_rows, cols), lambda i: (i, 0)),
        ],
        out_specs=pl.BlockSpec((block_rows, cols), lambda i: (i, 0)),
        compiler_params=pltpu.CompilerParams(
            dimension_semantics=("parallel",),
            vmem_limit_bytes=vmem_limit_bytes,
        ),
        cost_estimate=cost,
    )(d2, l2)


def pairwise_loss(distances, labels, margin, *, min_pallas_elems=_MIN_PALLAS_ELEMS):
    """Forward pass of PairwiseLoss: relu(margin - labels * (1 - distances)).

    `margin` must be a static Python scalar (module hyperparameter).
    """
    assert distances.shape == labels.shape, "distances/labels must match"
    orig_shape = distances.shape
    dtype = distances.dtype
    n = distances.size

    labels = labels.astype(dtype)

    # Tiny inputs: pallas_call launch overhead dominates; let XLA fuse it.
    if n < min_pallas_elems or n < _LANE_COLS:
        return jnp.maximum(margin - labels * (1.0 - distances), 0.0).astype(dtype)

    num_cores = _num_tensorcores()
    sublane = _sublane(dtype)
    if num_cores == 1:
        # v5e/v6e: 128 MiB physical VMEM, 1 TC -> big 8 MiB tiles (f32).
        target_rows = 2048
        vmem_limit = 64 * 1024 * 1024
    else:
        # v7x: 64 MiB physical VMEM, 2 TCs -> 4 MiB tiles, balanced grid.
        target_rows = 1024
        vmem_limit = 48 * 1024 * 1024

    d_flat = distances.reshape(-1)
    l_flat = labels.reshape(-1)
    bulk = (n // _LANE_COLS) * _LANE_COLS

    def run_bulk(df, lf):
        rows = df.size // _LANE_COLS
        d2 = df.reshape(rows, _LANE_COLS)
        l2 = lf.reshape(rows, _LANE_COLS)
        block_rows = _pick_block_rows(rows, sublane, num_cores, target_rows)
        return _pairwise_loss_2d(d2, l2, margin, block_rows, vmem_limit).reshape(-1)

    if bulk == n:
        # Lane-aligned: zero-copy reshape, no padding/stripping passes.
        return run_bulk(d_flat, l_flat).reshape(orig_shape)

    # Ragged: kernel on the aligned bulk, plain jnp on the (<1024-elem) tail.
    out_bulk = run_bulk(d_flat[:bulk], l_flat[:bulk])
    d_tail = d_flat[bulk:]
    l_tail = l_flat[bulk:]
    out_tail = jnp.maximum(margin - l_tail * (1.0 - d_tail), 0.0).astype(dtype)
    return jnp.concatenate([out_bulk, out_tail]).reshape(orig_shape)


if __name__ == "__main__":
    key = jax.random.PRNGKey(0)
    k1, k2, k3, k4, k5, k6 = jax.random.split(key, 6)
    margin = 0.5

    def ref_fn(d, l):
        return jnp.maximum(margin - l * (1.0 - d), 0.0)

    # 1) Small lane-aligned input (16*128 = 2*1024); force the Pallas path.
    d1 = jax.random.uniform(k1, (16, 128), dtype=jnp.float32) * 2.0
    l1 = jnp.where(jax.random.bernoulli(k2, 0.5, (16, 128)), 1.0, -1.0).astype(jnp.float32)
    o1 = jax.block_until_ready(pairwise_loss(d1, l1, margin, min_pallas_elems=0))
    assert o1.shape == d1.shape and o1.dtype == d1.dtype
    assert jnp.allclose(o1, ref_fn(d1, l1), atol=1e-6), "mismatch (aligned)"

    # 2) Ragged input (7*300 = 2100): exercises kernel-bulk + jnp-tail split.
    d2 = jax.random.uniform(k3, (7, 300), dtype=jnp.float32) * 2.0
    l2 = jnp.where(jax.random.bernoulli(k4, 0.5, (7, 300)), 1.0, -1.0).astype(jnp.float32)
    o2 = jax.block_until_ready(pairwise_loss(d2, l2, margin, min_pallas_elems=0))
    assert o2.shape == d2.shape
    assert jnp.allclose(o2, ref_fn(d2, l2), atol=1e-6), "mismatch (ragged)"

    # 3) Default path: large enough to take the Pallas route automatically.
    d3 = jax.random.uniform(k5, (512, 1024), dtype=jnp.float32) * 2.0
    l3 = jnp.where(jax.random.bernoulli(k6, 0.5, (512, 1024)), 1.0, -1.0).astype(jnp.float32)
    o3 = jax.block_until_ready(pairwise_loss(d3, l3, margin))
    assert jnp.allclose(o3, ref_fn(d3, l3), atol=1e-6), "mismatch (large)"

    print("KERNEL_OK")
</pallas_src>

<mosaic_0001>
module attributes {stable_mosaic.version = 11 : i64} {
  func.func @_pairwise_loss_kernel(%arg0: i32, %arg1: memref<2x1024xf32, #tpu.memory_space<vmem>>, %arg2: memref<2x1024xf32, #tpu.memory_space<vmem>>, %arg3: memref<2x1024xf32, #tpu.memory_space<vmem>>) attributes {dimension_semantics = [#tpu.dimension_semantics<parallel>], iteration_bounds = array<i64: 1>, scalar_prefetch = 0 : i64, scratch_operands = 0 : i64, tpu.core_type = #tpu.core_type<tc>, window_params = [{transform_indices = @transform_0, window_bounds = array<i64: 2, 1024>}, {transform_indices = @transform_1, window_bounds = array<i64: 2, 1024>}, {transform_indices = @transform_2, window_bounds = array<i64: 2, 1024>}]} {
    %c0 = arith.constant 0 : index
    %c0_0 = arith.constant 0 : index
    %0 = vector.load %arg1[%c0, %c0_0] : memref<2x1024xf32, #tpu.memory_space<vmem>>, vector<2x1024xf32>
    %c0_1 = arith.constant 0 : index
    %c0_2 = arith.constant 0 : index
    %1 = vector.load %arg2[%c0_1, %c0_2] : memref<2x1024xf32, #tpu.memory_space<vmem>>, vector<2x1024xf32>
    %cst = arith.constant 1.000000e+00 : f32
    %2 = vector.broadcast %cst : f32 to vector<2x1024xf32>
    %3 = arith.subf %2, %0 : vector<2x1024xf32>
    %4 = arith.mulf %1, %3 : vector<2x1024xf32>
    %cst_3 = arith.constant 5.000000e-01 : f32
    %5 = vector.broadcast %cst_3 : f32 to vector<2x1024xf32>
    %6 = arith.subf %5, %4 : vector<2x1024xf32>
    %cst_4 = arith.constant 0.000000e+00 : f32
    %7 = vector.broadcast %cst_4 : f32 to vector<2x1024xf32>
    %8 = arith.maximumf %6, %7 : vector<2x1024xf32>
    %c0_5 = arith.constant 0 : index
    %c0_6 = arith.constant 0 : index
    %9 = vector.load %arg3[%c0_5, %c0_6] : memref<2x1024xf32, #tpu.memory_space<vmem>>, vector<2x1024xf32>
    tpu.vector_store %arg3[%c0_5, %c0_6], %8 {strides = array<i32>} : memref<2x1024xf32, #tpu.memory_space<vmem>>, vector<2x1024xf32>,
    return
  }
  func.func @transform_0(%arg0: i32) -> (i32, i32) {
    %c0_i32 = arith.constant 0 : i32
    %c0_i32_0 = arith.constant 0 : i32
    return %arg0, %c0_i32 : i32, i32
  }
  func.func @transform_1(%arg0: i32) -> (i32, i32) {
    %c0_i32 = arith.constant 0 : i32
    %c0_i32_0 = arith.constant 0 : i32
    return %arg0, %c0_i32 : i32, i32
  }
  func.func @transform_2(%arg0: i32) -> (i32, i32) {
    %c0_i32 = arith.constant 0 : i32
    %c0_i32_0 = arith.constant 0 : i32
    return %arg0, %c0_i32 : i32, i32
  }
}

</mosaic_0001>

<bundles_post_ra>
// kernel: tpu_custom_call.1
= control target key start
LH: loop header
LB: loop body
LE: loop exit
PB: predicated region body
PF: predicated region fallthrough
CT: control target
= control target key end

     0   :  { %7 = vsyncpa [#allocation3], 0  ;;  %s195_s0 = inlined_call_operand.hbm [shape: f32[2,1024], index: 0, kind: input, shape index: {}]   ;;  %s196_s1 = inlined_call_operand.hbm [shape: f32[2,1024], index: 1, kind: input, shape index: {}]   ;;  %s197_s2 = inlined_call_operand.hbm [shape: f32[2,1024], index: 2, kind: output, shape index: {}]  }
   0x1   :  { %8 = vsyncpa [#allocation6], 0 }
   0x2   :  { %9 = vsyncpa [#allocation4], 0  ;;  %s141_s9 = smov [#allocation2]   ;;  %s142_s11 = smov [#allocation5]  }
   0x3   :  { %s16_s10 = sshll.u32 %s141_s9, 4  ;;  %s26_s12 = sshll.u32 %s142_s11, 4  ;;  %s17_s10 = int_to_ptr.vmem [resolvable:$true] %s16_s10  ;;  %s27_s12 = int_to_ptr.vmem [resolvable:$true] %s26_s12 }
   0x4   :  { %s69_s15 = scalar_lea.hbm %s195_s0, 256 }
   0x5   :  { %p70_p0 = scmp.ne.s32.totalorder %s195_s0, %s69_s15  ;;  %p73_p1 = scmp.lt.u32.totalorder %s69_s15, %s195_s0 }
   0x7   :  { %p75_p2 = pnand %p73_p1, %p70_p0 }
   0x9   :  { %78 = shalt.err (!%p75_p2)
}
   0xa   :  { %s79_s20 = scalar_lea.vmem %s17_s10, 256  ;;  %p84_p4 = scmp.lt.s32.totalorder %s17_s10, %s17_s10 }
   0xb   :  { %p80_p3 = scmp.ne.s32.totalorder %s17_s10, %s79_s20  ;;  %p85_p5 = scmp.lt.s32.totalorder %s79_s20, %s79_s20 }
   0xd   :  { %p86_p6 = por %p85_p5, %p84_p4 }
   0xf   :  { %p87_p7 = pnand %p86_p6, %p80_p3 }
  0x11   :  { %90 = shalt.err (!%p87_p7)
}
  0x12   :  { %19 = dma.hbm_to_vmem [thread:$0]  %s195_s0, 256, %s17_s10, [#allocation3]  }
  0x13   :  { %s91_s25 = scalar_lea.hbm %s196_s1, 256 }
  0x14   :  { %p92_p8 = scmp.ne.s32.totalorder %s196_s1, %s91_s25  ;;  %p95_p9 = scmp.lt.u32.totalorder %s91_s25, %s196_s1 }
  0x16   :  { %p97_p10 = pnand %p95_p9, %p92_p8 }
  0x18   :  { %100 = shalt.err (!%p97_p10)
}
  0x19   :  { %s101_s30 = scalar_lea.vmem %s27_s12, 256  ;;  %p106_p12 = scmp.lt.s32.totalorder %s27_s12, %s27_s12 }
  0x1a   :  { %p102_p11 = scmp.ne.s32.totalorder %s27_s12, %s101_s30  ;;  %p107_p13 = scmp.lt.s32.totalorder %s101_s30, %s101_s30 }
  0x1c   :  { %p108_p0 = por %p107_p13, %p106_p12 }
  0x1e   :  { %p109_p1 = pnand %p108_p0, %p102_p11 }
  0x20   :  { %112 = shalt.err (!%p109_p1)
}
  0x21   :  { %29 = dma.hbm_to_vmem [thread:$0]  %s196_s1, 256, %s27_s12, [#allocation6]  }
  0x22   :  { %135 = dma.done.wait [#allocation3], 256  }
  0x23   :  { %136 = vsyncadd [#allocation3], 4294967040 }
  0x24   :  { %137 = dma.done.wait [#allocation6], 256  }
  0x25   :  { %138 = vsyncadd [#allocation6], 4294967040  ;;  %v36_v0 = vld [vmem:[#allocation2] sm:$0xff]  ;;  %v38_v1 = vld [vmem:[#allocation5] sm:$0xff]  ;;  %s143_s4 = smov [#allocation7]  }
  0x26   :  { %v37_v2 = vld [vmem:[#allocation2 + $0x8] sm:$0xff]  ;;  %v40_v3 = vsub.f32 1.0, %v36_v0  ;;  %v39_v4 = vld [vmem:[#allocation5 + $0x8] sm:$0xff]  ;;  %s56_s5 = sshll.u32 %s143_s4, 4  ;;  %s57_s5 = int_to_ptr.vmem [resolvable:$true] %s56_s5 }
  0x27   :  { %v41_v5 = vsub.f32 1.0, %v37_v2  ;;  %s113_s1 = scalar_lea.vmem %s57_s5, 256  ;;  %p118_p3 = scmp.lt.s32.totalorder %s57_s5, %s57_s5 }
  0x28   :  { %v42_v6 = vmul.f32 %v40_v3, %v38_v1  ;;  %p114_p2 = scmp.ne.s32.totalorder %s57_s5, %s113_s1  ;;  %p119_p4 = scmp.lt.s32.totalorder %s113_s1, %s113_s1 }
  0x29   :  { %v43_v7 = vmul.f32 %v41_v5, %v39_v4 }
  0x2a   :  { %v44_v8 = vsub.f32 0.5, %v42_v6  ;;  %p120_p5 = por %p119_p4, %p118_p3 }
  0x2b   :  { %v45_v9 = vsub.f32 0.5, %v43_v7 }
  0x2c   :  { %v46_v10 = vmax.f32 %v44_v8, 0.0  ;;  %p121_p6 = pnand %p120_p5, %p114_p2 }
  0x2d   :  { %v47_v11 = vmax.f32 %v45_v9, 0.0 }
  0x2e   :  { %48 = vst [vmem:[#allocation7] sm:$0xff] %v46_v10 }
  0x2f   :  { %49 = vst [vmem:[#allocation7 + $0x8] sm:$0xff] %v47_v11 }
  0x30   :  { %124 = shalt.err (!%p121_p6)
}
  0x31   :  { %s125_s8 = scalar_lea.hbm %s197_s2, 256 }
  0x32   :  { %p126_p7 = scmp.ne.s32.totalorder %s197_s2, %s125_s8  ;;  %p129_p8 = scmp.lt.u32.totalorder %s125_s8, %s197_s2 }
  0x34   :  { %p131_p9 = pnand %p129_p8, %p126_p7 }
  0x36   :  { %134 = shalt.err (!%p131_p9)
}
  0x37   :  { %59 = dma.vmem_to_hbm [thread:$0]  %s57_s5, 256, %s197_s2, [#allocation4]  }
  0x38   :  { %139 = dma.done.wait [#allocation4], 256  }
  0x39   :  { %140 = vsyncadd [#allocation4], 4294967040 }
  0x3a   :  { %63 = vsyncpa [#allocation3], 1 }
  0x3b   :  { %64 = vsyncpa [#allocation6], 1 }
  0x3c   :  { %65 = vsyncpa [#allocation4], 1 }

</bundles_post_ra>
